<compile_context>
chip_gen: v5e
topology: v5e:2x2
jax: 0.10.0
libtpu: 0.0.40
codegen_flags: <defaults>
</compile_context>

<pallas_src>
import math
import functools

import jax
import jax.numpy as jnp
from jax.experimental import pallas as pl
from jax.experimental.pallas import tpu as pltpu


def _round_up(v, mult):
    return ((v + mult - 1) // mult) * mult


def _vmem_limit_bytes():
    """Generation-aware scoped-VMEM request with headroom for compiler scratch."""
    cap = 64 * 1024 * 1024  # conservative fallback (v7x per-TC VMEM)
    try:
        cap = int(pltpu.get_tpu_info().vmem_capacity_bytes)
    except Exception:
        pass
    # ~80% of physical, and always >= 12 MiB of headroom, floor at 32 MiB.
    return max(min(int(cap * 0.8), cap - 12 * 1024 * 1024), 32 * 1024 * 1024)


def _angular_penalty_kernel(labels_ref, xn_ref, w_ref, out_ref,
                            tgt_ref, m_ref, l_ref,
                            *, loss_type, s, m, eps, c_real, c_pad, tile_c):
    """One (batch-tile i, class-tile k) grid step.

    labels_ref: (TM, 1) int32    resident across k
    xn_ref:     (TM, D) bf16     L2-normalized rows, resident across k
    w_ref:      (D, TC) bf16     W^T tile, streamed over k (classes)
    out_ref:    (TM, 1) f32      per-row L, written at the last k step
    tgt_ref:    (TM, 1) scratch  accumulated target logit wf[i, labels[i]]
    m_ref/l_ref:(TM, 1) scratch  online log-sum-exp state over ALL columns
                                 (target/padding removed at finalize)
    """
    k = pl.program_id(1)
    n_k = pl.num_programs(1)

    @pl.when(k == 0)
    def _init():
        tgt_ref[...] = jnp.zeros_like(tgt_ref)
        m_ref[...] = jnp.full_like(m_ref, -1e30)
        l_ref[...] = jnp.zeros_like(l_ref)

    # (TM, D) @ (D, TC) -> (TM, TC): bf16 operands, f32 MXU accumulation.
    wf = jnp.dot(xn_ref[...], w_ref[...], preferred_element_type=jnp.float32)

    # Accumulate the target logit wf[i, labels[i]] across class tiles.
    # (Class-padding columns can never match a real label.)
    lab = labels_ref[...]                                              # (TM, 1)
    col = jax.lax.broadcasted_iota(jnp.int32, wf.shape, 1) + k * tile_c
    tgt_ref[...] += jnp.sum(jnp.where(col == lab, wf, 0.0),
                            axis=1, keepdims=True)

    # Unmasked online log-sum-exp of s*wf over ALL columns of this tile.
    # Because the target column is inside the running max, the exp argument
    # is always <= 0 (no overflow).  s > 0, so max(s*wf) == s*max(wf).
    m_new = jnp.maximum(m_ref[...], s * jnp.max(wf, axis=1, keepdims=True))
    l_ref[...] = (l_ref[...] * jnp.exp(m_ref[...] - m_new)
                  + jnp.sum(jnp.exp(s * wf - m_new), axis=1, keepdims=True))
    m_ref[...] = m_new

    @pl.when(k == n_k - 1)
    def _finalize():
        t = tgt_ref[...]
        if loss_type == "arcface":
            tcl = jnp.clip(t, -1.0 + eps, 1.0 - eps)
            # cos(acos(t) + m) == t*cos(m) - sqrt(1 - t^2)*sin(m)
            numerator = s * (tcl * math.cos(m)
                             - jnp.sqrt(1.0 - tcl * tcl) * math.sin(m))
        elif loss_type == "cosface":
            numerator = s * (t - m)
        else:  # sphereface
            tcl = jnp.clip(t, -1.0 + eps, 1.0 - eps)
            numerator = s * jnp.cos(m * jnp.arccos(tcl))

        mx = m_ref[...]
        lx = l_ref[...]
        # Remove the target column and (statically, if present) the zero
        # class-padding columns (each contributes exp(s*0 - mx)) from the
        # accumulated sum; clamp to guard FP cancellation.
        l_excl = lx - jnp.exp(s * t - mx)
        if c_pad > c_real:
            # mx >= 0 here (padding columns contribute s*0 to the max).
            l_excl = l_excl - float(c_pad - c_real) * jnp.exp(-mx)
        l_excl = jnp.maximum(l_excl, 0.0)

        # L = numerator - log(exp(numerator) + sum_{j != y} exp(s*wf_j)),
        # evaluated stably from the (max, sum) state.
        big = jnp.maximum(numerator, mx)
        log_den = big + jnp.log(jnp.exp(numerator - big)
                                + l_excl * jnp.exp(mx - big))
        out_ref[...] = numerator - log_den


def angular_penalty_sm_loss(x, labels, weight, *, loss_type="arcface",
                            eps=1e-7, s=None, m=None,
                            tm=1024, tc=2048, compute_dtype=jnp.bfloat16):
    """x: (N, in_features) f32, labels: (N,) int, weight: (out_features, in_features)."""
    loss_type = loss_type.lower()
    assert loss_type in ("arcface", "sphereface", "cosface")
    defaults = {"arcface": (64.0, 0.5), "sphereface": (64.0, 1.35),
                "cosface": (30.0, 0.4)}
    d_s, d_m = defaults[loss_type]
    s = d_s if s is None else s
    m = d_m if m is None else m

    n, d = x.shape
    c, d2 = weight.shape
    assert d == d2
    assert labels.shape == (n,)

    # --- tile sizing -------------------------------------------------------
    # Batch tile TM is the lever that reduces W HBM traffic (W is re-streamed
    # once per batch tile), so keep it as large as the VMEM budget allows.
    tm = min(tm, _round_up(n, 8))
    tc = min(tc, _round_up(c, 128))
    d_pad = _round_up(d, 128)

    vmem_limit = _vmem_limit_bytes()

    def _footprint(t_m, t_c):
        return (2 * t_m * d_pad * 2          # xn input, double-buffered bf16
                + 2 * d_pad * t_c * 2        # W^T tile, double-buffered bf16
                + 3 * t_m * t_c * 4          # (tm,tc) f32 temporaries (wf/exp)
                + 8 * t_m * 128 * 4)         # labels/out/per-row scratch (lane-padded)

    budget = int(0.8 * vmem_limit)
    while _footprint(tm, tc) > budget and (tm > 128 or tc > 256):
        if tm > 128:
            tm //= 2
        else:
            tc //= 2
    tm = max(8, (tm // 8) * 8)
    tc = max(128, (tc // 128) * 128)

    n_pad = _round_up(n, tm)
    c_pad = _round_up(c, tc)

    # --- host-side (XLA) prep ---------------------------------------------
    # F.normalize(x, p=2, dim=1) done once in the wrapper; ship bf16 rows.
    xf = x.astype(jnp.float32)
    row_norm = jnp.sqrt(jnp.sum(xf * xf, axis=1, keepdims=True))
    xn = (xf / jnp.maximum(row_norm, 1e-12)).astype(compute_dtype)
    xn = jnp.pad(xn, ((0, n_pad - n), (0, d_pad - d)))

    lab_p = jnp.pad(labels.astype(jnp.int32), (0, n_pad - n)).reshape(n_pad, 1)

    # Raw (unnormalized) W, matching the PyTorch module; bf16, zero-padded on
    # both dims and pre-transposed once to (D, C) so the kernel contraction is
    # a plain (TM,D)@(D,TC) — no in-kernel transpose of the streamed tile.
    w_t = jnp.pad(weight.astype(compute_dtype),
                  ((0, c_pad - c), (0, d_pad - d))).T          # (d_pad, c_pad)

    kernel = functools.partial(
        _angular_penalty_kernel,
        loss_type=loss_type, s=float(s), m=float(m), eps=float(eps),
        c_real=int(c), c_pad=int(c_pad), tile_c=int(tc))

    grid = (n_pad // tm, c_pad // tc)

    out = pl.pallas_call(
        kernel,
        out_shape=jax.ShapeDtypeStruct((n_pad, 1), jnp.float32),
        grid_spec=pltpu.PrefetchScalarGridSpec(
            num_scalar_prefetch=0,
            grid=grid,
            in_specs=[
                pl.BlockSpec((tm, 1), lambda i, k: (i, 0)),       # labels (resident)
                pl.BlockSpec((tm, d_pad), lambda i, k: (i, 0)),   # xn (resident over k)
                # W^T tile streamed over classes.  If the trace shows this DMA
                # exposed at batch-tile boundaries, add
                # pipeline_mode=pl.Buffered(3).
                pl.BlockSpec((d_pad, tc), lambda i, k: (0, k)),
            ],
            out_specs=pl.BlockSpec((tm, 1), lambda i, k: (i, 0)),
            scratch_shapes=[
                pltpu.VMEM((tm, 1), jnp.float32),     # target logit accum
                pltpu.VMEM((tm, 1), jnp.float32),     # running max
                pltpu.VMEM((tm, 1), jnp.float32),     # running sum
            ]),
        # On v7x, if xprof shows one TensorCore idle, switch the first axis to
        # pltpu.CORE_PARALLEL and size tm so n_pad//tm is even.
        compiler_params=pltpu.CompilerParams(
            dimension_semantics=("parallel", "arbitrary"),
            vmem_limit_bytes=vmem_limit),
    )(lab_p, xn, w_t)

    # -mean(L) over the real (unpadded) rows — trivial reduction, done in XLA.
    return -jnp.sum(out[:n, 0]) / n


def _reference_loss(x, labels, W, *, loss_type, s, m, eps=1e-7,
                    compute_dtype=jnp.bfloat16):
    # Pure-JAX transcription of the torch forward (same bf16 matmul precision
    # as the kernel), used as a silent sanity check.
    xn = x / jnp.maximum(jnp.linalg.norm(x, axis=1, keepdims=True), 1e-12)
    wf = jnp.dot(xn.astype(compute_dtype), W.astype(compute_dtype).T,
                 preferred_element_type=jnp.float32)
    tgt = wf[jnp.arange(x.shape[0]), labels]
    if loss_type == "arcface":
        num = s * jnp.cos(jnp.arccos(jnp.clip(tgt, -1.0 + eps, 1.0 - eps)) + m)
    elif loss_type == "cosface":
        num = s * (tgt - m)
    else:
        num = s * jnp.cos(m * jnp.arccos(jnp.clip(tgt, -1.0 + eps, 1.0 - eps)))
    onehot = jax.nn.one_hot(labels, W.shape[0], dtype=bool)
    excl = jnp.sum(jnp.where(onehot, 0.0, jnp.exp(s * wf)), axis=1)
    L = num - jnp.log(jnp.exp(num) + excl)
    return -jnp.mean(L)


if __name__ == "__main__":
    key = jax.random.PRNGKey(0)
    kx, kw, kl, kx2, kw2, kl2 = jax.random.split(key, 6)

    # --- arcface, tiny shapes (exercises batch/class/feature padding) ------
    N, D, C = 8, 32, 16
    x = jax.random.normal(kx, (N, D), dtype=jnp.float32)
    weight = jax.random.normal(kw, (C, D), dtype=jnp.float32) / math.sqrt(D)
    labels = jax.random.randint(kl, (N,), 0, C, dtype=jnp.int32)

    loss = jax.block_until_ready(
        angular_penalty_sm_loss(x, labels, weight, loss_type="arcface"))
    ref = _reference_loss(x, labels, weight, loss_type="arcface", s=64.0, m=0.5)
    assert bool(jnp.isfinite(loss)), loss
    assert jnp.allclose(loss, ref, rtol=2e-3, atol=2e-3), (loss, ref)

    # --- cosface, non-multiple-of-tile shapes -------------------------------
    N2, D2, C2 = 20, 48, 40
    x2 = jax.random.normal(kx2, (N2, D2), dtype=jnp.float32)
    w2 = jax.random.normal(kw2, (C2, D2), dtype=jnp.float32) / math.sqrt(D2)
    l2 = jax.random.randint(kl2, (N2,), 0, C2, dtype=jnp.int32)

    loss2 = jax.block_until_ready(
        angular_penalty_sm_loss(x2, l2, w2, loss_type="cosface"))
    ref2 = _reference_loss(x2, l2, w2, loss_type="cosface", s=30.0, m=0.4)
    assert bool(jnp.isfinite(loss2)), loss2
    assert jnp.allclose(loss2, ref2, rtol=2e-3, atol=2e-3), (loss2, ref2)

    # --- sphereface on the same odd shapes ----------------------------------
    loss3 = jax.block_until_ready(
        angular_penalty_sm_loss(x2, l2, w2, loss_type="sphereface"))
    ref3 = _reference_loss(x2, l2, w2, loss_type="sphereface", s=64.0, m=1.35)
    assert bool(jnp.isfinite(loss3)), loss3
    assert jnp.allclose(loss3, ref3, rtol=2e-3, atol=2e-3), (loss3, ref3)

    print("KERNEL_OK")
</pallas_src>

<mosaic_0001>
module attributes {stable_mosaic.version = 11 : i64} {
  func.func @_angular_penalty_kernel(%arg0: i32, %arg1: i32, %arg2: memref<8x1xi32, #tpu.memory_space<vmem>>, %arg3: memref<8x128xbf16, #tpu.memory_space<vmem>>, %arg4: memref<128x128xbf16, #tpu.memory_space<vmem>>, %arg5: memref<8x1xf32, #tpu.memory_space<vmem>>, %arg6: memref<8x1xf32, #tpu.memory_space<vmem>>, %arg7: memref<8x1xf32, #tpu.memory_space<vmem>>, %arg8: memref<8x1xf32, #tpu.memory_space<vmem>>) attributes {dimension_semantics = [#tpu.dimension_semantics<parallel>, #tpu.dimension_semantics<arbitrary>], iteration_bounds = array<i64: 1, 1>, scalar_prefetch = 0 : i64, scratch_operands = 3 : i64, tpu.core_type = #tpu.core_type<tc>, window_params = [{transform_indices = @transform_0, window_bounds = array<i64: 8, 1>}, {transform_indices = @transform_1, window_bounds = array<i64: 8, 128>}, {transform_indices = @transform_2, window_bounds = array<i64: 128, 128>}, {transform_indices = @transform_3, window_bounds = array<i64: 8, 1>}]} {
    %c0_i32 = arith.constant 0 : i32
    %0 = arith.cmpi eq, %arg1, %c0_i32 : i32
    %1 = arith.extui %0 : i1 to i32
    %c0_i32_0 = arith.constant 0 : i32
    %2 = arith.cmpi ne, %1, %c0_i32_0 : i32
    scf.if %2 {
      %cst_28 = arith.constant 0.000000e+00 : f32
      %44 = vector.broadcast %cst_28 : f32 to vector<8x1xf32>
      %c0_29 = arith.constant 0 : index
      %c0_30 = arith.constant 0 : index
      %45 = vector.load %arg6[%c0_29, %c0_30] : memref<8x1xf32, #tpu.memory_space<vmem>>, vector<8x1xf32>
      tpu.vector_store %arg6[%c0_29, %c0_30], %44 {strides = array<i32>} : memref<8x1xf32, #tpu.memory_space<vmem>>, vector<8x1xf32>,
      %cst_31 = arith.constant -1.000000e+30 : f32
      %46 = vector.broadcast %cst_31 : f32 to vector<8x1xf32>
      %c0_32 = arith.constant 0 : index
      %c0_33 = arith.constant 0 : index
      %47 = vector.load %arg7[%c0_32, %c0_33] : memref<8x1xf32, #tpu.memory_space<vmem>>, vector<8x1xf32>
      tpu.vector_store %arg7[%c0_32, %c0_33], %46 {strides = array<i32>} : memref<8x1xf32, #tpu.memory_space<vmem>>, vector<8x1xf32>,
      %cst_34 = arith.constant 0.000000e+00 : f32
      %48 = vector.broadcast %cst_34 : f32 to vector<8x1xf32>
      %c0_35 = arith.constant 0 : index
      %c0_36 = arith.constant 0 : index
      %49 = vector.load %arg8[%c0_35, %c0_36] : memref<8x1xf32, #tpu.memory_space<vmem>>, vector<8x1xf32>
      tpu.vector_store %arg8[%c0_35, %c0_36], %48 {strides = array<i32>} : memref<8x1xf32, #tpu.memory_space<vmem>>, vector<8x1xf32>,
    } else {
    }
    %c0 = arith.constant 0 : index
    %c0_1 = arith.constant 0 : index
    %3 = vector.load %arg3[%c0, %c0_1] : memref<8x128xbf16, #tpu.memory_space<vmem>>, vector<8x128xbf16>
    %c0_2 = arith.constant 0 : index
    %c0_3 = arith.constant 0 : index
    %4 = vector.load %arg4[%c0_2, %c0_3] : memref<128x128xbf16, #tpu.memory_space<vmem>>, vector<128x128xbf16>
    %cst = arith.constant dense<0.000000e+00> : vector<8x128xf32>
    %5 = tpu.matmul %3, %4, %cst {dimension_numbers = #tpu.dot_dimension_numbers<[1], [0], [0], [1], [0, 0, 1, 1], [], []>} : vector<8x128xbf16>, vector<128x128xbf16>, vector<8x128xf32> -> vector<8x128xf32>
    %c0_4 = arith.constant 0 : index
    %c0_5 = arith.constant 0 : index
    %6 = vector.load %arg2[%c0_4, %c0_5] : memref<8x1xi32, #tpu.memory_space<vmem>>, vector<8x1xi32>
    %7 = tpu.iota {dimensions = array<i32: 1>} : vector<8x128xi32>
    %c128_i32 = arith.constant 128 : i32
    %8 = arith.muli %arg1, %c128_i32 : i32
    %9 = vector.broadcast %8 : i32 to vector<8x128xi32>
    %10 = arith.addi %7, %9 : vector<8x128xi32>
    %c0_6 = arith.constant 0 : index
    %c0_7 = arith.constant 0 : index
    %11 = vector.load %arg6[%c0_6, %c0_7] : memref<8x1xf32, #tpu.memory_space<vmem>>, vector<8x1xf32>
    %12 = vector.broadcast %6 : vector<8x1xi32> to vector<8x128xi32>
    %13 = arith.cmpi eq, %10, %12 : vector<8x128xi32>
    %cst_8 = arith.constant 0.000000e+00 : f32
    %14 = vector.broadcast %cst_8 : f32 to vector<8x128xf32>
    %15 = arith.select %13, %5, %14 : vector<8x128xi1>, vector<8x128xf32>
    %cst_9 = arith.constant dense<0.000000e+00> : vector<8xf32>
    %16 = vector.multi_reduction <add>, %15, %cst_9 [1] : vector<8x128xf32> to vector<8xf32>
    %17 = vector.shape_cast %16 : vector<8xf32> to vector<8x1xf32>
    %18 = arith.addf %11, %17 : vector<8x1xf32>
    %c0_10 = arith.constant 0 : index
    %c0_11 = arith.constant 0 : index
    %19 = vector.load %arg6[%c0_10, %c0_11] : memref<8x1xf32, #tpu.memory_space<vmem>>, vector<8x1xf32>
    tpu.vector_store %arg6[%c0_10, %c0_11], %18 {strides = array<i32>} : memref<8x1xf32, #tpu.memory_space<vmem>>, vector<8x1xf32>,
    %c0_12 = arith.constant 0 : index
    %c0_13 = arith.constant 0 : index
    %20 = vector.load %arg7[%c0_12, %c0_13] : memref<8x1xf32, #tpu.memory_space<vmem>>, vector<8x1xf32>
    %cst_14 = arith.constant dense<0xFF800000> : vector<8xf32>
    %21 = vector.multi_reduction <maximumf>, %5, %cst_14 [1] : vector<8x128xf32> to vector<8xf32>
    %22 = vector.shape_cast %21 : vector<8xf32> to vector<8x1xf32>
    %cst_15 = arith.constant 6.400000e+01 : f32
    %23 = vector.broadcast %cst_15 : f32 to vector<8x1xf32>
    %24 = arith.mulf %23, %22 : vector<8x1xf32>
    %25 = arith.maximumf %20, %24 : vector<8x1xf32>
    %c0_16 = arith.constant 0 : index
    %c0_17 = arith.constant 0 : index
    %26 = vector.load %arg8[%c0_16, %c0_17] : memref<8x1xf32, #tpu.memory_space<vmem>>, vector<8x1xf32>
    %c0_18 = arith.constant 0 : index
    %c0_19 = arith.constant 0 : index
    %27 = vector.load %arg7[%c0_18, %c0_19] : memref<8x1xf32, #tpu.memory_space<vmem>>, vector<8x1xf32>
    %28 = arith.subf %27, %25 : vector<8x1xf32>
    %29 = math.exp %28 : vector<8x1xf32>
    %30 = arith.mulf %26, %29 : vector<8x1xf32>
    %cst_20 = arith.constant 6.400000e+01 : f32
    %31 = vector.broadcast %cst_20 : f32 to vector<8x128xf32>
    %32 = arith.mulf %31, %5 : vector<8x128xf32>
    %33 = vector.broadcast %25 : vector<8x1xf32> to vector<8x128xf32>
    %34 = arith.subf %32, %33 : vector<8x128xf32>
    %35 = math.exp %34 : vector<8x128xf32>
    %cst_21 = arith.constant dense<0.000000e+00> : vector<8xf32>
    %36 = vector.multi_reduction <add>, %35, %cst_21 [1] : vector<8x128xf32> to vector<8xf32>
    %37 = vector.shape_cast %36 : vector<8xf32> to vector<8x1xf32>
    %38 = arith.addf %30, %37 : vector<8x1xf32>
    %c0_22 = arith.constant 0 : index
    %c0_23 = arith.constant 0 : index
    %39 = vector.load %arg8[%c0_22, %c0_23] : memref<8x1xf32, #tpu.memory_space<vmem>>, vector<8x1xf32>
    tpu.vector_store %arg8[%c0_22, %c0_23], %38 {strides = array<i32>} : memref<8x1xf32, #tpu.memory_space<vmem>>, vector<8x1xf32>,
    %c0_24 = arith.constant 0 : index
    %c0_25 = arith.constant 0 : index
    %40 = vector.load %arg7[%c0_24, %c0_25] : memref<8x1xf32, #tpu.memory_space<vmem>>, vector<8x1xf32>
    tpu.vector_store %arg7[%c0_24, %c0_25], %25 {strides = array<i32>} : memref<8x1xf32, #tpu.memory_space<vmem>>, vector<8x1xf32>,
    %c0_i32_26 = arith.constant 0 : i32
    %41 = arith.cmpi eq, %arg1, %c0_i32_26 : i32
    %42 = arith.extui %41 : i1 to i32
    %c0_i32_27 = arith.constant 0 : i32
    %43 = arith.cmpi ne, %42, %c0_i32_27 : i32
    scf.if %43 {
      %c0_28 = arith.constant 0 : index
      %c0_29 = arith.constant 0 : index
      %44 = vector.load %arg6[%c0_28, %c0_29] : memref<8x1xf32, #tpu.memory_space<vmem>>, vector<8x1xf32>
      %cst_30 = arith.constant -0.99999988 : f32
      %cst_31 = arith.constant 0.99999988 : f32
      %45 = vector.broadcast %cst_30 : f32 to vector<8x1xf32>
      %46 = arith.maximumf %45, %44 : vector<8x1xf32>
      %47 = vector.broadcast %cst_31 : f32 to vector<8x1xf32>
      %48 = arith.minimumf %47, %46 : vector<8x1xf32>
      %cst_32 = arith.constant 0.87758255 : f32
      %49 = vector.broadcast %cst_32 : f32 to vector<8x1xf32>
      %50 = arith.mulf %48, %49 : vector<8x1xf32>
      %51 = arith.mulf %48, %48 : vector<8x1xf32>
      %cst_33 = arith.constant 1.000000e+00 : f32
      %52 = vector.broadcast %cst_33 : f32 to vector<8x1xf32>
      %53 = arith.subf %52, %51 : vector<8x1xf32>
      %54 = math.sqrt %53 : vector<8x1xf32>
      %cst_34 = arith.constant 0.47942555 : f32
      %55 = vector.broadcast %cst_34 : f32 to vector<8x1xf32>
      %56 = arith.mulf %54, %55 : vector<8x1xf32>
      %57 = arith.subf %50, %56 : vector<8x1xf32>
      %cst_35 = arith.constant 6.400000e+01 : f32
      %58 = vector.broadcast %cst_35 : f32 to vector<8x1xf32>
      %59 = arith.mulf %58, %57 : vector<8x1xf32>
      %c0_36 = arith.constant 0 : index
      %c0_37 = arith.constant 0 : index
      %60 = vector.load %arg7[%c0_36, %c0_37] : memref<8x1xf32, #tpu.memory_space<vmem>>, vector<8x1xf32>
      %c0_38 = arith.constant 0 : index
      %c0_39 = arith.constant 0 : index
      %61 = vector.load %arg8[%c0_38, %c0_39] : memref<8x1xf32, #tpu.memory_space<vmem>>, vector<8x1xf32>
      %cst_40 = arith.constant 6.400000e+01 : f32
      %62 = vector.broadcast %cst_40 : f32 to vector<8x1xf32>
      %63 = arith.mulf %62, %44 : vector<8x1xf32>
      %64 = arith.subf %63, %60 : vector<8x1xf32>
      %65 = math.exp %64 : vector<8x1xf32>
      %66 = arith.subf %61, %65 : vector<8x1xf32>
      %cst_41 = arith.constant 0.000000e+00 : f32
      %67 = vector.broadcast %cst_41 : f32 to vector<8x1xf32>
      %68 = arith.subf %67, %60 : vector<8x1xf32>
      %69 = math.exp %68 : vector<8x1xf32>
      %cst_42 = arith.constant 1.120000e+02 : f32
      %70 = vector.broadcast %cst_42 : f32 to vector<8x1xf32>
      %71 = arith.mulf %70, %69 : vector<8x1xf32>
      %72 = arith.subf %66, %71 : vector<8x1xf32>
      %cst_43 = arith.constant 0.000000e+00 : f32
      %73 = vector.broadcast %cst_43 : f32 to vector<8x1xf32>
      %74 = arith.maximumf %72, %73 : vector<8x1xf32>
      %75 = arith.maximumf %59, %60 : vector<8x1xf32>
      %76 = arith.subf %59, %75 : vector<8x1xf32>
      %77 = math.exp %76 : vector<8x1xf32>
      %78 = arith.subf %60, %75 : vector<8x1xf32>
      %79 = math.exp %78 : vector<8x1xf32>
      %80 = arith.mulf %74, %79 : vector<8x1xf32>
      %81 = arith.addf %77, %80 : vector<8x1xf32>
      %82 = math.log %81 : vector<8x1xf32>
      %83 = arith.addf %75, %82 : vector<8x1xf32>
      %84 = arith.subf %59, %83 : vector<8x1xf32>
      %c0_44 = arith.constant 0 : index
      %c0_45 = arith.constant 0 : index
      %85 = vector.load %arg5[%c0_44, %c0_45] : memref<8x1xf32, #tpu.memory_space<vmem>>, vector<8x1xf32>
      tpu.vector_store %arg5[%c0_44, %c0_45], %84 {strides = array<i32>} : memref<8x1xf32, #tpu.memory_space<vmem>>, vector<8x1xf32>,
    } else {
    }
    return
  }
  func.func @transform_0(%arg0: i32, %arg1: i32) -> (i32, i32) {
    %c0_i32 = arith.constant 0 : i32
    %c0_i32_0 = arith.constant 0 : i32
    return %arg0, %c0_i32 : i32, i32
  }
  func.func @transform_1(%arg0: i32, %arg1: i32) -> (i32, i32) {
    %c0_i32 = arith.constant 0 : i32
    %c0_i32_0 = arith.constant 0 : i32
    return %arg0, %c0_i32 : i32, i32
  }
  func.func @transform_2(%arg0: i32, %arg1: i32) -> (i32, i32) {
    %c0_i32 = arith.constant 0 : i32
    %c0_i32_0 = arith.constant 0 : i32
    return %c0_i32, %arg1 : i32, i32
  }
  func.func @transform_3(%arg0: i32, %arg1: i32) -> (i32, i32) {
    %c0_i32 = arith.constant 0 : i32
    %c0_i32_0 = arith.constant 0 : i32
    return %arg0, %c0_i32 : i32, i32
  }
}

</mosaic_0001>

<bundles_post_ra>
// kernel: tpu_custom_call.1
= control target key start
LH: loop header
LB: loop body
LE: loop exit
PB: predicated region body
PF: predicated region fallthrough
CT: control target
= control target key end

     0   :  { %8 = vsyncpa [#allocation6], 0  ;;  %s304_s15 = smov [#allocation5]   ;;  %s305_s17 = smov 64   ;;  %s349_s0 = inlined_call_operand.vmem [shape: s32[8,1], index: 0, kind: input, shape index: {}]   ;;  %s350_s1 = inlined_call_operand.vmem [shape: bf16[8,128], index: 1, kind: input, shape index: {}]   ;;  %s351_s2 = inlined_call_operand.hbm [shape: bf16[128,128], index: 2, kind: input, shape index: {}]   ;;  %s352_s3 = inlined_call_operand.vmem [shape: f32[8,1], index: 3, kind: output, shape index: {}]  }
   0x1   :  { %s17_s14 = sshll.u32 %s351_s2, 4  ;;  %s19_s16 = sshll.u32 %s304_s15, 4  ;;  %s18_s14 = int_to_ptr.hbm [resolvable:$true] %s17_s14  ;;  %s20_s16 = int_to_ptr.vmem [resolvable:$true] %s19_s16 }
   0x2   :  { %s306_s18 = smov 4  }
   0x3   :  { %25 = dma.hbm_to_vmem [thread:$0]  %s18_s14, 1024, %s20_s16, [#allocation6], %s305_s17, %s305_s17, %s306_s18  }
   0x4   :  { %302 = dma.done.wait [#allocation6], 1024  }
   0x5   :  { %303 = vsyncadd [#allocation6], 4294966272  ;;  %v253_v0 = vld [vmem:[#allocation5 + $0x38] sm:$0xff]  ;;  %v252_v1 = vld [vmem:[#allocation5 + $0x30] sm:$0xff]  ;;  %v307_v9 = vmov 0   ;;  %vm34_vm0 = vcmask 7168   ;;  %v117_v20 = vlaneseq }
   0x6   :  { %103 = vmatpush.bf16.msra.mxu0 %v253_v0  ;;  %v251_v2 = vld [vmem:[#allocation5 + $0x28] sm:$0xff]  ;;  %v250_v3 = vld [vmem:[#allocation5 + $0x20] sm:$0xff]  ;;  %v249_v4 = vld [vmem:[#allocation5 + $0x18] sm:$0xff]  ;;  %260 = vset.pattern.permute.xlu0 %v307_v9  ;;  %v308_v10 = vmov -1e+30   ;;  %v309_v14 = vmov 0.0  }
   0x7   :  { %v248_v5 = vld [vmem:[#allocation5 + $0x10] sm:$0xff]  ;;  %v247_v6 = vld [vmem:[#allocation5 + $0x8] sm:$0xff]  ;;  %v246_v7 = vld [vmem:[#allocation5] sm:$0xff]  ;;  %261 = vset.pattern.permute.xlu1 %v307_v9  ;;  %36 = vst.msk [vmem:[#allocation3] sm:$0xff] %vm34_vm0, %v308_v10  ;;  %v118_v21 = vand.u32 127, %v117_v20 }
   0x8   :  { %v38_v8 = vld [vmem:[%s350_s1] sm:$0xf]  ;;  %35 = vst.msk [vmem:[#allocation2] sm:$0xff] %vm34_vm0, %v309_v14 }
   0x9   :  { %v116_v13 = vld [vmem:[%s349_s0] sm:$0xff]  ;;  %37 = vst.msk [vmem:[#allocation4] sm:$0xff] %vm34_vm0, %v309_v14 }
   0xa   :  { %104 = vmatpush.bf16.msra.mxu0 %v252_v1 }
   0xe   :  { %105 = vmatpush.bf16.msra.mxu0 %v251_v2  ;;  %v133_v16 = vld [vmem:[#allocation3] sm:$0xff] }
   0xf   :  { %v122_v29 = vld [vmem:[#allocation2] sm:$0xff] }
  0x10   :  { %v138_v56 = vld [vmem:[#allocation4] sm:$0xff] }
  0x12   :  { %106 = vmatpush.bf16.msra.mxu0 %v250_v3 }
  0x16   :  { %107 = vmatpush.bf16.msra.mxu0 %v249_v4 }
  0x1a   :  { %108 = vmatpush.bf16.msra.mxu0 %v248_v5 }
  0x1e   :  { %109 = vmatpush.bf16.msra.mxu0 %v247_v6 }
  0x22   :  { %110 = vmatpush.bf16.msra.mxu0 %v246_v7 }
  0x25   :  { %111 = vmatmul.bf16.vlgmr.msra.gmra.mxu0 %v38_v8 }
  0xa2   :  { %v112_v11 = vpop.f32.mrf.mxu0 }
  0xa3   :  { %134 = vmax.xlane.f32.xlu0 %v112_v11  ;;  %v143_v24 = vmul.f32 64.0, %v112_v11 }
  0xaa   :  { %v114_v12 = vpop.f32.mrf.mxu0 }
  0xb7   :  { %124 = vperm.xlu0 %260, %v116_v13  }
 0x116   :  { %v135_v15 = vpop.xlane.xlu0 %134 }
 0x117   :  { %v136_v17 = vmul.f32 64.0, %v135_v15 }
 0x119   :  { %v137_v18 = vmax.f32 %v133_v16, %v136_v17 }
 0x11b   :  { %v139_v19 = vsub.f32 %v133_v16, %v137_v18  ;;  %156 = vst.msk [vmem:[#allocation3] sm:$0xff] %vm34_vm0, %v137_v18  ;;  %146 = vperm.xlu1 %261, %v137_v18  }
 0x11d   :  { %v140_v46 = vmul.f32 1.442695, %v139_v19 }
 0x122   :  { %v181_v50 = vld [vmem:[#allocation3] sm:$0xff] }
 0x123   :  { %v188_v52 = vsub.f32 0.0, %v181_v50 }
 0x125   :  { %v189_v57 = vmul.f32 1.442695, %v188_v52 }
 0x129   :  { %v125_v22 = vpop.permute.xlu0 %124 }
 0x12a   :  { %vm126_vm1 = vcmp.eq.s32.totalorder %v118_v21, %v125_v22 }
 0x12b   :  { %v127_v23 = vsel %vm126_vm1, %v112_v11, 0.0 }
 0x145   :  { %128 = vadd.xlane.f32.xlu1 %v127_v23 }
 0x18d   :  { %v147_v25 = vpop.permute.xlu1 %146 }
 0x18e   :  { %v149_v26 = vsub.f32 %v143_v24, %v147_v25 }
 0x190   :  { %v150_v27 = vmul.f32 1.442695, %v149_v26 }
 0x192   :  { %262 = vpow2.f32 %v150_v27 }
 0x198   :  { %v263_v28 = vpop.eup %262 }
 0x199   :  { %152 = vadd.xlane.f32.xlu2 %v263_v28 }
 0x1b8   :  { %v129_v30 = vpop.xlane.xlu1 %128 }
 0x1b9   :  { %v130_v31 = vadd.f32 %v129_v30, %v122_v29 }
 0x1bb   :  { %132 = vst.msk [vmem:[#allocation2] sm:$0xff] %vm34_vm0, %v130_v31 }
 0x1c2   :  { %v160_v32 = vld [vmem:[#allocation2] sm:$0xff] }
 0x1c3   :  { %v245_v33 = vclamps-f32 %v160_v32, 0.9999999  ;;  %v183_v51 = vmul.f32 64.0, %v160_v32 }
 0x1c5   :  { %v164_v34 = vmul.f32 %v245_v33, %v245_v33  ;;  %v163_v48 = vmul.f32 0.87758255, %v245_v33  ;;  %v184_v55 = vsub.f32 %v183_v51, %v181_v50 }
 0x1c7   :  { %v165_v35 = vsub.f32 1.0, %v164_v34  ;;  %v185_v60 = vmul.f32 1.442695, %v184_v55 }
 0x1c9   :  { %264 = vrsqrt.f32 %v165_v35  ;;  %vm173_vm2 = vcmp.eq.f32.partialorder %v165_v35, inf  ;;  %v176_v44 = vand.u32 2147483648, %v165_v35  ;;  %vm175_vm3 = vcmp.eq.f32.partialorder %v165_v35, 0.0 }
 0x1ca   :  { %266 = vpow2.f32 %v140_v46 }
 0x1cb   :  { %268 = vpow2.f32 %v189_v57 }
 0x1cc   :  { %270 = vpow2.f32 %v185_v60 }
 0x1cf   :  { %v265_v36 = vpop.eup %264 }
 0x1d0   :  { %v167_v37 = vmul.f32 %v265_v36, %v165_v35  ;;  %v267_v54 = vpop.eup %266 }
 0x1d1   :  { %v142_v59 = vmul.f32 %v267_v54, %v138_v56  ;;  %v269_v2 = vpop.eup %268 }
 0x1d2   :  { %v168_v38 = vmul.f32 %v265_v36, %v167_v37  ;;  %v271_v4 = vpop.eup %270  ;;  %v191_v7 = vmul.f32 112.0, %v269_v2 }
 0x1d4   :  { %v169_v39 = vmul.f32 0.5, %v168_v38 }
 0x1d6   :  { %v170_v40 = vsub.f32 1.5, %v169_v39 }
 0x1d8   :  { %v171_v41 = vmul.f32 %v265_v36, %v170_v40 }
 0x1da   :  { %v172_v42 = vmul.f32 %v171_v41, %v165_v35 }
 0x1dc   :  { %v174_v43 = vsel %vm173_vm2, %v165_v35, %v172_v42 }
 0x1dd   :  { %v177_v45 = vsel %vm175_vm3, %v176_v44, %v174_v43 }
 0x1de   :  { %v178_v47 = vmul.f32 0.47942555, %v177_v45 }
 0x1e0   :  { %v179_v49 = vsub.f32 %v163_v48, %v178_v47 }
 0x1e2   :  { %v180_v53 = vmul.f32 64.0, %v179_v49 }
 0x1e4   :  { %v194_v58 = vmax.f32 %v180_v53, %v181_v50 }
 0x1e6   :  { %v198_v63 = vsub.f32 %v181_v50, %v194_v58  ;;  %v195_v0 = vsub.f32 %v180_v53, %v194_v58 }
 0x1e8   :  { %v199_v1 = vmul.f32 1.442695, %v198_v63  ;;  %v196_v3 = vmul.f32 1.442695, %v195_v0 }
 0x1ea   :  { %272 = vpow2.f32 %v199_v1 }
 0x1eb   :  { %274 = vpow2.f32 %v196_v3 }
 0x1f0   :  { %v273_v10 = vpop.eup %272 }
 0x1f1   :  { %v275_v12 = vpop.eup %274 }
 0x20c   :  { %v153_v61 = vpop.xlane.xlu2 %152 }
 0x20d   :  { %v154_v62 = vadd.f32 %v153_v61, %v142_v59 }
 0x20f   :  { %155 = vst.msk [vmem:[#allocation4] sm:$0xff] %vm34_vm0, %v154_v62 }
 0x216   :  { %v182_v5 = vld [vmem:[#allocation4] sm:$0xff] }
 0x217   :  { %v187_v6 = vsub.f32 %v182_v5, %v271_v4 }
 0x219   :  { %v192_v8 = vsub.f32 %v187_v6, %v191_v7 }
 0x21b   :  { %v193_v9 = vmax.f32 %v192_v8, 0.0 }
 0x21d   :  { %v201_v11 = vmul.f32 %v273_v10, %v193_v9 }
 0x21f   :  { %v202_v13 = vadd.f32 %v275_v12, %v201_v11 }
 0x221   :  { %276 = vlog2.f32 %v202_v13 }
 0x227   :  { %v277_v14 = vpop.eup %276 }
 0x228   :  { %v204_v15 = vmul.f32 0.6931472, %v277_v14 }
 0x22a   :  { %v205_v16 = vadd.f32 %v204_v15, %v194_v58 }
 0x22c   :  { %v206_v17 = vsub.f32 %v180_v53, %v205_v16 }
 0x22e   :  { %207 = vst.msk [vmem:[%s352_s3] sm:$0xff] %vm34_vm0, %v206_v17 }
 0x22f   :  { %212 = vsyncpa [#allocation6], 1 }

</bundles_post_ra>
